<compile_context>
chip_gen: v6e
topology: v6e:2x2x1
jax: 0.10.0
libtpu: 0.0.40
codegen_flags: <defaults>
</compile_context>

<pallas_src>
import functools
import math

import jax
import jax.numpy as jnp
from jax.experimental import pallas as pl
from jax.experimental.pallas import tpu as pltpu

_HALO_OFF = 128   # lane offset of the image inside the padded scratch (>= W+1)
_CIN_PAD = 16     # bf16 packs 16 rows per sublane tile -> pad channels to 16


def _round_up(v, m):
    return (v + m - 1) // m * m


def _choose_b_blk(n, hw, max_lanes=2048):
    """Largest divisor of n with b*hw <= max_lanes, keeping >= 2 grid steps."""
    best = 1
    for b in range(1, n + 1):
        if n % b:
            continue
        if b * hw > max_lanes:
            continue
        if n >= 2 and n // b < 2:
            continue
        best = max(best, b)
    return best


def pred_kernel(x_ref, wc_ref, b1_ref, w2_ref, b2_ref, o_ref,
                xpad_ref, slab_ref, *, H, W, B_blk, cpad):
    """B_blk batch images per grid step; everything lane-dense on H*W.

    x_ref   : (B_blk, cpad, H*W)  bf16  channel-padded flattened NCHW input
    wc_ref  : (Coutp, 9*cpad)     bf16  folded depthwise*pointwise*BN-scale weights
    b1_ref  : (Coutp, 1)          f32   folded BN bias
    w2_ref  : (Ppad, Coutp)       bf16  conv2 1x1 weights
    b2_ref  : (Ppad, 1)           f32   conv2 bias
    o_ref   : (B_blk, Ppad, H*W)  f32   output tile
    xpad_ref: (B_blk*cpad, XPW)   bf16  lane-padded image copies (halo = zeros)
    slab_ref: (9*cpad, B_blk*HW)  bf16  im2col slab (tap-major channel blocks)
    """
    HW = H * W
    xpw = xpad_ref.shape[1]

    # Column-validity masks, built in-kernel (no HBM input / extra DMA).
    col = jax.lax.broadcasted_iota(jnp.int32, (1, HW), 1) % W
    mask_l = col >= 1            # reading column w-1 is valid
    mask_r = col <= W - 2        # reading column w+1 is valid

    # Zero ONLY the halo bands (128-lane aligned, unmasked stores).  The
    # interior is fully overwritten below and the bands are never written, so
    # this is persistence-safe even when the parallel grid is split across
    # TensorCores.  No slab zeroing: every slab row block is fully rewritten.
    rows = xpad_ref.shape[0]
    xpad_ref[:, 0:_HALO_OFF] = jnp.zeros((rows, _HALO_OFF), xpad_ref.dtype)
    xpad_ref[:, _HALO_OFF + HW:xpw] = jnp.zeros(
        (rows, xpw - _HALO_OFF - HW), xpad_ref.dtype)

    # Stage each (channel-padded) image at an aligned lane offset.
    for b in range(B_blk):
        xpad_ref[b * cpad:(b + 1) * cpad, _HALO_OFF:_HALO_OFF + HW] = x_ref[b]

    # im2col: 9 lane-shifted views per image -> slab rows.  Writes are full
    # packed-sublane blocks (cpad rows) => no masked partial stores.  Row
    # out-of-range reads land in the zero halo; column wrap is killed by the
    # column masks (select, so safe regardless of halo contents anyway).
    for kh in range(3):
        for kw in range(3):
            t = kh * 3 + kw
            s = (kh - 1) * W + (kw - 1)                   # flattened shift
            for b in range(B_blk):
                xs = xpad_ref[b * cpad:(b + 1) * cpad,
                              _HALO_OFF + s:_HALO_OFF + s + HW]
                if kw == 0:
                    xs = jnp.where(mask_l, xs, jnp.zeros_like(xs))
                elif kw == 2:
                    xs = jnp.where(mask_r, xs, jnp.zeros_like(xs))
                slab_ref[t * cpad:(t + 1) * cpad, b * HW:(b + 1) * HW] = xs

    # conv1 (depthwise + pointwise + BN scale) as ONE bf16 MXU matmul, f32 acc.
    y = jnp.dot(wc_ref[...], slab_ref[...],
                preferred_element_type=jnp.float32)        # (Coutp, B*HW) f32
    y = jnp.maximum(y + b1_ref[...], 0.0)

    # conv2: 1x1 conv + bias -> second bf16 MXU matmul, lane-dense f32 output.
    out = jnp.dot(w2_ref[...], y.astype(jnp.bfloat16),
                  preferred_element_type=jnp.float32) + b2_ref[...]  # (Ppad, B*HW)

    for b in range(B_blk):
        o_ref[b] = out[:, b * HW:(b + 1) * HW]


def pred_forward(x_nchw, params):
    """x_nchw: (N, Cin, H, W) float32 -> (N, P, H, W) float32."""
    N, Cin, H, W = x_nchw.shape
    HW = H * W
    wc, b1, w2, b2 = params["wc"], params["b1"], params["w2"], params["b2"]
    cpad = wc.shape[1] // 9
    coutp = wc.shape[0]
    ppad = w2.shape[0]
    P = params["p"]
    assert params["cin"] == Cin
    assert W + 1 <= _HALO_OFF, "image width too large for the fixed halo offset"
    # TODO(synk): for real detection resolutions (large H/W/Cin) tile over H with
    # a 1-row overlapping halo sized for v7x's 64 MiB VMEM (slab is ~9x the input
    # tile) and set pltpu.CompilerParams(vmem_limit_bytes=...) accordingly.

    B_blk = _choose_b_blk(N, HW)
    assert N % B_blk == 0

    # Host-side: cast to bf16 and pad channels once (cheap; lets every in-kernel
    # slab write be a full packed-sublane block and halves the input DMA bytes).
    x_flat = x_nchw.astype(jnp.bfloat16).reshape(N, Cin, HW)
    x_pad = jnp.pad(x_flat, ((0, 0), (0, cpad - Cin), (0, 0)))

    xpw = _HALO_OFF + HW + 128                             # padded scratch width
    kernel = functools.partial(pred_kernel, H=H, W=W, B_blk=B_blk, cpad=cpad)

    out_flat = pl.pallas_call(
        kernel,
        out_shape=jax.ShapeDtypeStruct((N, ppad, HW), jnp.float32),
        grid=(N // B_blk,),
        in_specs=[
            pl.BlockSpec((B_blk, cpad, HW), lambda g: (g, 0, 0)),
            pl.BlockSpec((coutp, 9 * cpad), lambda g: (0, 0)),
            pl.BlockSpec((coutp, 1), lambda g: (0, 0)),
            pl.BlockSpec((ppad, coutp), lambda g: (0, 0)),
            pl.BlockSpec((ppad, 1), lambda g: (0, 0)),
        ],
        out_specs=pl.BlockSpec((B_blk, ppad, HW), lambda g: (g, 0, 0)),
        scratch_shapes=[
            pltpu.VMEM((B_blk * cpad, xpw), jnp.bfloat16),
            pltpu.VMEM((9 * cpad, B_blk * HW), jnp.bfloat16),
        ],
        compiler_params=pltpu.CompilerParams(dimension_semantics=("parallel",)),
    )(x_pad, wc, b1, w2, b2)

    return out_flat[:, :P, :].reshape(N, ppad, H, W)[:, :P] if False else \
        out_flat[:, :P, :].reshape(N, P, H, W)


def init_params(key, in_size, out_size, totol_pred_num, std=0.01, eps=1e-5):
    """Deterministic init mirroring Pred.__init__ (normal std=0.01 on conv
    weights, zero conv biases, conv2 bias = -log((1-0.01)/0.01), fresh BN)."""
    k1, k2, k3 = jax.random.split(key, 3)
    # PyTorch-shaped weights (OIHW)
    w_dw_oihw = std * jax.random.normal(k1, (in_size, 1, 3, 3), jnp.float32)
    w_pw_oihw = std * jax.random.normal(k2, (out_size, in_size, 1, 1), jnp.float32)
    w2_oihw = std * jax.random.normal(k3, (totol_pred_num, out_size, 1, 1), jnp.float32)
    b2 = jnp.full((totol_pred_num,), -math.log((1 - 0.01) / 0.01), jnp.float32)

    # BatchNorm2d default init, eval mode.
    gamma = jnp.ones((out_size,), jnp.float32)
    beta = jnp.zeros((out_size,), jnp.float32)
    mean = jnp.zeros((out_size,), jnp.float32)
    var = jnp.ones((out_size,), jnp.float32)
    bn_scale = gamma / jnp.sqrt(var + eps)
    bn_bias = beta - mean * bn_scale

    cpad = _round_up(in_size, _CIN_PAD)
    coutp = _round_up(out_size, 8)
    ppad = _round_up(totol_pred_num, 8)

    w_dw = w_dw_oihw[:, 0].reshape(in_size, 9)            # (Cin, 9)
    w_pw = w_pw_oihw[:, :, 0, 0]                          # (Cout, Cin)
    w2 = w2_oihw[:, :, 0, 0]                              # (P, Cout)

    # Fold depthwise * pointwise * BN-scale into one matmul weight:
    #   Wc[cout, t, c] = bn_scale[cout] * w_pw[cout, c] * w_dw[c, t],  t = kh*3+kw
    wc = bn_scale[:, None, None] * w_pw[:, None, :] * w_dw.T[None, :, :]
    wc = jnp.pad(wc, ((0, coutp - out_size), (0, 0), (0, cpad - in_size)))
    wc = wc.reshape(coutp, 9 * cpad).astype(jnp.bfloat16)

    b1 = jnp.pad(bn_bias, (0, coutp - out_size))[:, None]                     # (Coutp, 1)
    w2p = jnp.pad(w2, ((0, ppad - totol_pred_num),
                       (0, coutp - out_size))).astype(jnp.bfloat16)           # (Ppad, Coutp)
    b2p = jnp.pad(b2, (0, ppad - totol_pred_num))[:, None]                    # (Ppad, 1)

    kernel_params = {
        "wc": wc, "b1": b1, "w2": w2p, "b2": b2p,
        "cin": in_size, "p": totol_pred_num,
    }
    torch_params = {
        "w_dw_oihw": w_dw_oihw, "w_pw_oihw": w_pw_oihw, "w2_oihw": w2_oihw,
        "b2": b2, "gamma": gamma, "beta": beta, "mean": mean, "var": var,
        "eps": eps,
    }
    return kernel_params, torch_params


def ref_forward(x, tp):
    """Pure-JAX NCHW reference mirroring the PyTorch forward exactly (f32)."""
    dn = ("NCHW", "OIHW", "NCHW")
    y = jax.lax.conv_general_dilated(
        x, tp["w_dw_oihw"], (1, 1), ((1, 1), (1, 1)),
        feature_group_count=x.shape[1], dimension_numbers=dn)
    y = jax.lax.conv_general_dilated(y, tp["w_pw_oihw"], (1, 1), "VALID",
                                     dimension_numbers=dn)
    y = ((y - tp["mean"][None, :, None, None])
         / jnp.sqrt(tp["var"][None, :, None, None] + tp["eps"])
         * tp["gamma"][None, :, None, None] + tp["beta"][None, :, None, None])
    y = jnp.maximum(y, 0.0)
    y = jax.lax.conv_general_dilated(y, tp["w2_oihw"], (1, 1), "VALID",
                                     dimension_numbers=dn)
    return y + tp["b2"][None, :, None, None]


if __name__ == "__main__":
    N, Cin, H, W = 2, 4, 16, 16      # in_size = 4
    Cout = 8                         # out_size = 8
    P = 6                            # totol_pred_num = 6

    key = jax.random.PRNGKey(0)
    kx, kp = jax.random.split(key)
    x = jax.random.normal(kx, (N, Cin, H, W), jnp.float32)

    kernel_params, torch_params = init_params(kp, Cin, Cout, P)

    out = pred_forward(x, kernel_params)
    out = jax.block_until_ready(out)

    ref = ref_forward(x, torch_params)
    assert out.shape == (N, P, H, W), out.shape
    # Tolerance loosened vs. 1e-5 because matmul operands are bf16 (f32 accum);
    # at these magnitudes the observed error is far below this bound.
    assert jnp.allclose(out, ref, atol=2e-3, rtol=2e-3), \
        float(jnp.max(jnp.abs(out - ref)))

    print("KERNEL_OK")
</pallas_src>

<mosaic_0001>
module attributes {stable_mosaic.version = 11 : i64} {
  func.func @pred_kernel(%arg0: i32, %arg1: memref<1x16x256xbf16, #tpu.memory_space<vmem>>, %arg2: memref<8x144xbf16, #tpu.memory_space<vmem>>, %arg3: memref<8x1xf32, #tpu.memory_space<vmem>>, %arg4: memref<8x8xbf16, #tpu.memory_space<vmem>>, %arg5: memref<8x1xf32, #tpu.memory_space<vmem>>, %arg6: memref<1x8x256xf32, #tpu.memory_space<vmem>>, %arg7: memref<16x512xbf16, #tpu.memory_space<vmem>>, %arg8: memref<144x256xbf16, #tpu.memory_space<vmem>>) attributes {dimension_semantics = [#tpu.dimension_semantics<parallel>], iteration_bounds = array<i64: 2>, scalar_prefetch = 0 : i64, scratch_operands = 2 : i64, tpu.core_type = #tpu.core_type<tc>, window_params = [{transform_indices = @transform_0, window_bounds = array<i64: 1, 16, 256>}, {pipeline_mode = #tpu.pipeline_mode<synchronous>, transform_indices = @transform_1, window_bounds = array<i64: 8, 144>}, {pipeline_mode = #tpu.pipeline_mode<synchronous>, transform_indices = @transform_2, window_bounds = array<i64: 8, 1>}, {pipeline_mode = #tpu.pipeline_mode<synchronous>, transform_indices = @transform_3, window_bounds = array<i64: 8, 8>}, {pipeline_mode = #tpu.pipeline_mode<synchronous>, transform_indices = @transform_4, window_bounds = array<i64: 8, 1>}, {transform_indices = @transform_5, window_bounds = array<i64: 1, 8, 256>}]} {
    %0 = tpu.iota {dimensions = array<i32: 1>} : vector<1x256xi32>
    %c16_i32 = arith.constant 16 : i32
    %c0_i32 = arith.constant 0 : i32
    %1 = arith.cmpi eq, %c16_i32, %c0_i32 : i32
    %c1_i32 = arith.constant 1 : i32
    %2 = arith.select %1, %c1_i32, %c16_i32 : i32
    %3 = vector.broadcast %2 : i32 to vector<1x256xi32>
    %4 = arith.remsi %0, %3 : vector<1x256xi32>
    %c0_i32_0 = arith.constant 0 : i32
    %5 = vector.broadcast %c0_i32_0 : i32 to vector<1x256xi32>
    %6 = arith.cmpi ne, %4, %5 : vector<1x256xi32>
    %c0_i32_1 = arith.constant 0 : i32
    %7 = vector.broadcast %c0_i32_1 : i32 to vector<1x256xi32>
    %8 = arith.cmpi slt, %4, %7 : vector<1x256xi32>
    %c0_i32_2 = arith.constant 0 : i32
    %9 = arith.cmpi slt, %2, %c0_i32_2 : i32
    %10 = vector.broadcast %9 : i1 to vector<1x256xi1>
    %11 = vector.broadcast %10 : vector<1x256xi1> to vector<1x256xi1>
    %12 = arith.xori %8, %11 : vector<1x256xi1>
    %13 = arith.andi %12, %6 : vector<1x256xi1>
    %14 = vector.broadcast %2 : i32 to vector<1x256xi32>
    %15 = arith.addi %4, %14 : vector<1x256xi32>
    %16 = arith.select %13, %15, %4 : vector<1x256xi1>, vector<1x256xi32>
    %c1_i32_3 = arith.constant 1 : i32
    %17 = vector.broadcast %c1_i32_3 : i32 to vector<1x256xi32>
    %18 = arith.cmpi sge, %16, %17 : vector<1x256xi32>
    %c14_i32 = arith.constant 14 : i32
    %19 = vector.broadcast %c14_i32 : i32 to vector<1x256xi32>
    %20 = arith.cmpi sle, %16, %19 : vector<1x256xi32>
    %cst = arith.constant 0.000000e+00 : bf16
    %21 = vector.broadcast %cst : bf16 to vector<16x128xbf16>
    %c0 = arith.constant 0 : index
    %c0_4 = arith.constant 0 : index
    %22 = vector.load %arg7[%c0, %c0_4] : memref<16x512xbf16, #tpu.memory_space<vmem>>, vector<16x128xbf16>
    tpu.vector_store %arg7[%c0, %c0_4], %21 {strides = array<i32>} : memref<16x512xbf16, #tpu.memory_space<vmem>>, vector<16x128xbf16>,
    %cst_5 = arith.constant 0.000000e+00 : bf16
    %23 = vector.broadcast %cst_5 : bf16 to vector<16x128xbf16>
    %c0_6 = arith.constant 0 : index
    %c384 = arith.constant 384 : index
    %24 = vector.load %arg7[%c0_6, %c384] : memref<16x512xbf16, #tpu.memory_space<vmem>>, vector<16x128xbf16>
    tpu.vector_store %arg7[%c0_6, %c384], %23 {strides = array<i32>} : memref<16x512xbf16, #tpu.memory_space<vmem>>, vector<16x128xbf16>,
    %c0_7 = arith.constant 0 : index
    %c0_8 = arith.constant 0 : index
    %c0_9 = arith.constant 0 : index
    %25 = vector.load %arg1[%c0_7, %c0_8, %c0_9] : memref<1x16x256xbf16, #tpu.memory_space<vmem>>, vector<1x16x256xbf16>
    %26 = vector.shape_cast %25 : vector<1x16x256xbf16> to vector<16x256xbf16>
    %c0_10 = arith.constant 0 : index
    %c128 = arith.constant 128 : index
    %27 = vector.load %arg7[%c0_10, %c128] : memref<16x512xbf16, #tpu.memory_space<vmem>>, vector<16x256xbf16>
    tpu.vector_store %arg7[%c0_10, %c128], %26 {strides = array<i32>} : memref<16x512xbf16, #tpu.memory_space<vmem>>, vector<16x256xbf16>,
    %c0_11 = arith.constant 0 : index
    %c111 = arith.constant 111 : index
    %28 = vector.load %arg7[%c0_11, %c111] : memref<16x512xbf16, #tpu.memory_space<vmem>>, vector<16x256xbf16>
    %cst_12 = arith.constant 0.000000e+00 : bf16
    %29 = vector.broadcast %cst_12 : bf16 to vector<16x256xbf16>
    %30 = vector.shape_cast %18 : vector<1x256xi1> to vector<1x256xi1>
    %31 = vector.broadcast %30 : vector<1x256xi1> to vector<16x256xi1>
    %32 = arith.select %31, %28, %29 : vector<16x256xi1>, vector<16x256xbf16>
    %c0_13 = arith.constant 0 : index
    %c0_14 = arith.constant 0 : index
    %33 = vector.load %arg8[%c0_13, %c0_14] : memref<144x256xbf16, #tpu.memory_space<vmem>>, vector<16x256xbf16>
    tpu.vector_store %arg8[%c0_13, %c0_14], %32 {strides = array<i32>} : memref<144x256xbf16, #tpu.memory_space<vmem>>, vector<16x256xbf16>,
    %c0_15 = arith.constant 0 : index
    %c112 = arith.constant 112 : index
    %34 = vector.load %arg7[%c0_15, %c112] : memref<16x512xbf16, #tpu.memory_space<vmem>>, vector<16x256xbf16>
    %c16 = arith.constant 16 : index
    %c0_16 = arith.constant 0 : index
    %35 = vector.load %arg8[%c16, %c0_16] : memref<144x256xbf16, #tpu.memory_space<vmem>>, vector<16x256xbf16>
    tpu.vector_store %arg8[%c16, %c0_16], %34 {strides = array<i32>} : memref<144x256xbf16, #tpu.memory_space<vmem>>, vector<16x256xbf16>,
    %c0_17 = arith.constant 0 : index
    %c113 = arith.constant 113 : index
    %36 = vector.load %arg7[%c0_17, %c113] : memref<16x512xbf16, #tpu.memory_space<vmem>>, vector<16x256xbf16>
    %cst_18 = arith.constant 0.000000e+00 : bf16
    %37 = vector.broadcast %cst_18 : bf16 to vector<16x256xbf16>
    %38 = vector.shape_cast %20 : vector<1x256xi1> to vector<1x256xi1>
    %39 = vector.broadcast %38 : vector<1x256xi1> to vector<16x256xi1>
    %40 = arith.select %39, %36, %37 : vector<16x256xi1>, vector<16x256xbf16>
    %c32 = arith.constant 32 : index
    %c0_19 = arith.constant 0 : index
    %41 = vector.load %arg8[%c32, %c0_19] : memref<144x256xbf16, #tpu.memory_space<vmem>>, vector<16x256xbf16>
    tpu.vector_store %arg8[%c32, %c0_19], %40 {strides = array<i32>} : memref<144x256xbf16, #tpu.memory_space<vmem>>, vector<16x256xbf16>,
    %c0_20 = arith.constant 0 : index
    %c127 = arith.constant 127 : index
    %42 = vector.load %arg7[%c0_20, %c127] : memref<16x512xbf16, #tpu.memory_space<vmem>>, vector<16x256xbf16>
    %cst_21 = arith.constant 0.000000e+00 : bf16
    %43 = vector.broadcast %cst_21 : bf16 to vector<16x256xbf16>
    %44 = vector.shape_cast %18 : vector<1x256xi1> to vector<1x256xi1>
    %45 = vector.broadcast %44 : vector<1x256xi1> to vector<16x256xi1>
    %46 = arith.select %45, %42, %43 : vector<16x256xi1>, vector<16x256xbf16>
    %c48 = arith.constant 48 : index
    %c0_22 = arith.constant 0 : index
    %47 = vector.load %arg8[%c48, %c0_22] : memref<144x256xbf16, #tpu.memory_space<vmem>>, vector<16x256xbf16>
    tpu.vector_store %arg8[%c48, %c0_22], %46 {strides = array<i32>} : memref<144x256xbf16, #tpu.memory_space<vmem>>, vector<16x256xbf16>,
    %c0_23 = arith.constant 0 : index
    %c128_24 = arith.constant 128 : index
    %48 = vector.load %arg7[%c0_23, %c128_24] : memref<16x512xbf16, #tpu.memory_space<vmem>>, vector<16x256xbf16>
    %c64 = arith.constant 64 : index
    %c0_25 = arith.constant 0 : index
    %49 = vector.load %arg8[%c64, %c0_25] : memref<144x256xbf16, #tpu.memory_space<vmem>>, vector<16x256xbf16>
    tpu.vector_store %arg8[%c64, %c0_25], %48 {strides = array<i32>} : memref<144x256xbf16, #tpu.memory_space<vmem>>, vector<16x256xbf16>,
    %c0_26 = arith.constant 0 : index
    %c129 = arith.constant 129 : index
    %50 = vector.load %arg7[%c0_26, %c129] : memref<16x512xbf16, #tpu.memory_space<vmem>>, vector<16x256xbf16>
    %cst_27 = arith.constant 0.000000e+00 : bf16
    %51 = vector.broadcast %cst_27 : bf16 to vector<16x256xbf16>
    %52 = vector.shape_cast %20 : vector<1x256xi1> to vector<1x256xi1>
    %53 = vector.broadcast %52 : vector<1x256xi1> to vector<16x256xi1>
    %54 = arith.select %53, %50, %51 : vector<16x256xi1>, vector<16x256xbf16>
    %c80 = arith.constant 80 : index
    %c0_28 = arith.constant 0 : index
    %55 = vector.load %arg8[%c80, %c0_28] : memref<144x256xbf16, #tpu.memory_space<vmem>>, vector<16x256xbf16>
    tpu.vector_store %arg8[%c80, %c0_28], %54 {strides = array<i32>} : memref<144x256xbf16, #tpu.memory_space<vmem>>, vector<16x256xbf16>,
    %c0_29 = arith.constant 0 : index
    %c143 = arith.constant 143 : index
    %56 = vector.load %arg7[%c0_29, %c143] : memref<16x512xbf16, #tpu.memory_space<vmem>>, vector<16x256xbf16>
    %cst_30 = arith.constant 0.000000e+00 : bf16
    %57 = vector.broadcast %cst_30 : bf16 to vector<16x256xbf16>
    %58 = vector.shape_cast %18 : vector<1x256xi1> to vector<1x256xi1>
    %59 = vector.broadcast %58 : vector<1x256xi1> to vector<16x256xi1>
    %60 = arith.select %59, %56, %57 : vector<16x256xi1>, vector<16x256xbf16>
    %c96 = arith.constant 96 : index
    %c0_31 = arith.constant 0 : index
    %61 = vector.load %arg8[%c96, %c0_31] : memref<144x256xbf16, #tpu.memory_space<vmem>>, vector<16x256xbf16>
    tpu.vector_store %arg8[%c96, %c0_31], %60 {strides = array<i32>} : memref<144x256xbf16, #tpu.memory_space<vmem>>, vector<16x256xbf16>,
    %c0_32 = arith.constant 0 : index
    %c144 = arith.constant 144 : index
    %62 = vector.load %arg7[%c0_32, %c144] : memref<16x512xbf16, #tpu.memory_space<vmem>>, vector<16x256xbf16>
    %c112_33 = arith.constant 112 : index
    %c0_34 = arith.constant 0 : index
    %63 = vector.load %arg8[%c112_33, %c0_34] : memref<144x256xbf16, #tpu.memory_space<vmem>>, vector<16x256xbf16>
    tpu.vector_store %arg8[%c112_33, %c0_34], %62 {strides = array<i32>} : memref<144x256xbf16, #tpu.memory_space<vmem>>, vector<16x256xbf16>,
    %c0_35 = arith.constant 0 : index
    %c145 = arith.constant 145 : index
    %64 = vector.load %arg7[%c0_35, %c145] : memref<16x512xbf16, #tpu.memory_space<vmem>>, vector<16x256xbf16>
    %cst_36 = arith.constant 0.000000e+00 : bf16
    %65 = vector.broadcast %cst_36 : bf16 to vector<16x256xbf16>
    %66 = vector.shape_cast %20 : vector<1x256xi1> to vector<1x256xi1>
    %67 = vector.broadcast %66 : vector<1x256xi1> to vector<16x256xi1>
    %68 = arith.select %67, %64, %65 : vector<16x256xi1>, vector<16x256xbf16>
    %c128_37 = arith.constant 128 : index
    %c0_38 = arith.constant 0 : index
    %69 = vector.load %arg8[%c128_37, %c0_38] : memref<144x256xbf16, #tpu.memory_space<vmem>>, vector<16x256xbf16>
    tpu.vector_store %arg8[%c128_37, %c0_38], %68 {strides = array<i32>} : memref<144x256xbf16, #tpu.memory_space<vmem>>, vector<16x256xbf16>,
    %c0_39 = arith.constant 0 : index
    %c0_40 = arith.constant 0 : index
    %70 = vector.load %arg2[%c0_39, %c0_40] : memref<8x144xbf16, #tpu.memory_space<vmem>>, vector<8x144xbf16>
    %c0_41 = arith.constant 0 : index
    %c0_42 = arith.constant 0 : index
    %71 = vector.load %arg8[%c0_41, %c0_42] : memref<144x256xbf16, #tpu.memory_space<vmem>>, vector<144x256xbf16>
    %cst_43 = arith.constant dense<0.000000e+00> : vector<8x256xf32>
    %72 = tpu.matmul %70, %71, %cst_43 {dimension_numbers = #tpu.dot_dimension_numbers<[1], [0], [0], [1], [0, 0, 1, 1], [], []>} : vector<8x144xbf16>, vector<144x256xbf16>, vector<8x256xf32> -> vector<8x256xf32>
    %c0_44 = arith.constant 0 : index
    %c0_45 = arith.constant 0 : index
    %73 = vector.load %arg3[%c0_44, %c0_45] : memref<8x1xf32, #tpu.memory_space<vmem>>, vector<8x1xf32>
    %74 = vector.broadcast %73 : vector<8x1xf32> to vector<8x256xf32>
    %75 = arith.addf %72, %74 : vector<8x256xf32>
    %cst_46 = arith.constant 0.000000e+00 : f32
    %76 = vector.broadcast %cst_46 : f32 to vector<8x256xf32>
    %77 = arith.maximumf %75, %76 : vector<8x256xf32>
    %c0_47 = arith.constant 0 : index
    %c0_48 = arith.constant 0 : index
    %78 = vector.load %arg4[%c0_47, %c0_48] : memref<8x8xbf16, #tpu.memory_space<vmem>>, vector<8x8xbf16>
    %79 = arith.truncf %77 : vector<8x256xf32> to vector<8x256xbf16>
    %cst_49 = arith.constant dense<0.000000e+00> : vector<8x256xf32>
    %80 = tpu.matmul %78, %79, %cst_49 {dimension_numbers = #tpu.dot_dimension_numbers<[1], [0], [0], [1], [0, 0, 1, 1], [], []>} : vector<8x8xbf16>, vector<8x256xbf16>, vector<8x256xf32> -> vector<8x256xf32>
    %c0_50 = arith.constant 0 : index
    %c0_51 = arith.constant 0 : index
    %81 = vector.load %arg5[%c0_50, %c0_51] : memref<8x1xf32, #tpu.memory_space<vmem>>, vector<8x1xf32>
    %82 = vector.broadcast %81 : vector<8x1xf32> to vector<8x256xf32>
    %83 = arith.addf %80, %82 : vector<8x256xf32>
    %c0_52 = arith.constant 0 : index
    %c0_53 = arith.constant 0 : index
    %c0_54 = arith.constant 0 : index
    %84 = vector.load %arg6[%c0_52, %c0_53, %c0_54] : memref<1x8x256xf32, #tpu.memory_space<vmem>>, vector<1x8x256xf32>
    %85 = vector.shape_cast %84 : vector<1x8x256xf32> to vector<8x256xf32>
    %86 = vector.shape_cast %83 : vector<8x256xf32> to vector<1x8x256xf32>
    tpu.vector_store %arg6[%c0_52, %c0_53, %c0_54], %86 {strides = array<i32>} : memref<1x8x256xf32, #tpu.memory_space<vmem>>, vector<1x8x256xf32>,
    return
  }
  func.func @transform_0(%arg0: i32) -> (i32, i32, i32) {
    %c0_i32 = arith.constant 0 : i32
    %c0_i32_0 = arith.constant 0 : i32
    %c0_i32_1 = arith.constant 0 : i32
    return %arg0, %c0_i32, %c0_i32_0 : i32, i32, i32
  }
  func.func @transform_1(%arg0: i32) -> (i32, i32) {
    %c0_i32 = arith.constant 0 : i32
    %c0_i32_0 = arith.constant 0 : i32
    %c0_i32_1 = arith.constant 0 : i32
    return %c0_i32, %c0_i32_0 : i32, i32
  }
  func.func @transform_2(%arg0: i32) -> (i32, i32) {
    %c0_i32 = arith.constant 0 : i32
    %c0_i32_0 = arith.constant 0 : i32
    %c0_i32_1 = arith.constant 0 : i32
    return %c0_i32, %c0_i32_0 : i32, i32
  }
  func.func @transform_3(%arg0: i32) -> (i32, i32) {
    %c0_i32 = arith.constant 0 : i32
    %c0_i32_0 = arith.constant 0 : i32
    %c0_i32_1 = arith.constant 0 : i32
    return %c0_i32, %c0_i32_0 : i32, i32
  }
  func.func @transform_4(%arg0: i32) -> (i32, i32) {
    %c0_i32 = arith.constant 0 : i32
    %c0_i32_0 = arith.constant 0 : i32
    %c0_i32_1 = arith.constant 0 : i32
    return %c0_i32, %c0_i32_0 : i32, i32
  }
  func.func @transform_5(%arg0: i32) -> (i32, i32, i32) {
    %c0_i32 = arith.constant 0 : i32
    %c0_i32_0 = arith.constant 0 : i32
    %c0_i32_1 = arith.constant 0 : i32
    return %arg0, %c0_i32, %c0_i32_0 : i32, i32, i32
  }
}

</mosaic_0001>

<bundles_post_ra>
// kernel: tpu_custom_call.1
= control target key start
LH: loop header
LB: loop body
LE: loop exit
PB: predicated region body
PF: predicated region fallthrough
CT: control target
= control target key end

     0   :  { %10 = vsyncpa [#allocation5], 0  ;;  %s1498_s0 = inlined_call_operand.hbm [shape: bf16[2,16,256], index: 0, kind: input, shape index: {}]   ;;  %s1499_s1 = inlined_call_operand.vmem [shape: bf16[8,144], index: 1, kind: input, shape index: {}]   ;;  %s1500_s2 = inlined_call_operand.vmem [shape: f32[8,1], index: 2, kind: input, shape index: {}]   ;;  %s1501_s3 = inlined_call_operand.vmem [shape: bf16[8,8], index: 3, kind: input, shape index: {}]   ;;  %s1502_s4 = inlined_call_operand.vmem [shape: f32[8,1], index: 4, kind: input, shape index: {}]   ;;  %s1503_s5 = inlined_call_operand.hbm [shape: f32[2,8,256], index: 5, kind: output, shape index: {}]  }
   0x1   :  { %12 = vsyncpa [#allocation5 + $0x1], 0 }
   0x2   :  { %13 = vsyncpa [#allocation6], 0 }
   0x3   :  { %15 = vsyncpa [#allocation6 + $0x1], 0  ;;  %s1149_s18 = smov 0   ;;  %s1151_s19 = smov 0  }
   0x4   :  { %s1153_s20 = smov 0   ;;  %s1155_s21 = smov 0  }
   0x5 LB: > { %s1170_s22 = sadd.s32 4294967295, %s1104_s21   ;;  %s910_s23 = sadd.s32 4294967294, %s1104_s21   ;;  %s1104_s21 = sphi %s1155_s21, %s1530_s21   ;;  %s1100_s20 = sphi %s1153_s20, %s1529_s20   ;;  %s1096_s19 = sphi %s1151_s19, %s1528_s19   ;;  %s1092_s18 = sphi %s1149_s18, %s1527_s18  }
   0x6   : > { %s1174_s24 = sadd.s32 1, %s1104_s21   ;;  %s28_s25 = sadd.s32 1, %s1100_s20 }
   0x7   : > { %s25_s26 = ssub.s32 %s1104_s21, %s1174_s24  ;;  %p35_p0 = scmp.ne.s32.totalorder %s1100_s20, %s1096_s19 }
   0x8   : > { %p26_p1 = scmp.eq.s32.totalorder %s25_s26, 0  ;;  %p36_p2 = scmp.eq.s32.totalorder %s1104_s21, 0 }
   0x9   : > { %p41_p3 = scmp.ne.s32.totalorder %s1096_s19, %s1092_s18  ;;  %p42_p4 = scmp.eq.s32.totalorder %s1170_s22, 0 }
   0xa   : > { %s1186_s27 = scalar_select %p26_p1, %s1100_s20, %s28_s25  }
   0xb   : > { %p1188_p5 = por %p36_p2, %p35_p0  ;;  %p1192_p6 = por %p42_p4, %p41_p3 }
   0xc   : > { %p149_p7 = scmp.eq.s32.totalorder %s1170_s22, 1  ;;  %p155_p8 = scmp.eq.s32.totalorder %s910_s23, 1 }
   0xd   : > { %s1507_s29 = scalar_select %p1192_p6, 1, 0 }
   0xe   : > { %p961_p10 = scmp.lt.s32.totalorder %s1104_s21, 2  ;;  %p1199_p11 = por %p149_p7, %p35_p0 }
   0xf   : > { %p1203_p12 = por %p155_p8, %p41_p3  ;;  %s187_s7 = sand.u32 1, %s1100_s20  }
  0x10   : > { %s1508_s30 = scalar_select %p1199_p11, 1, 0 }
  0x11   : > { %s1509_s6 = scalar_select %p1203_p12, 1, 0 }
  0x12   : > { %s947_s8 = sshll.u32 %s1104_s21, 8  ;;  %s913_s9 = sshll.u32 %s187_s7, 4 }
  0x13   : > { %s1212_s12 = scalar_lea.hbm %s1498_s0, %s947_s8  ;;  %s191_s13 = scalar_lea.vmem [#allocation4], %s913_s9 }
  0x14   : > { %s198_s14 = sshll.u32 %s191_s13, 4  ;;  %p1216_p13 = pnand %p961_p10, %p1188_p5  ;;  %s1220_s14 = int_to_ptr.vmem [resolvable:$true] %s198_s14 }
  0x15   : > { %s1222_s16 = scalar_lea.sflag [#allocation5], %s187_s7  ;;  %s1012_s17 = scalar_lea.hbm %s1212_s12, 256 }
  0x16   : > { %p1013_p0 = scmp.ne.s32.totalorder %s1212_s12, %s1012_s17  ;;  %p1014_p1 = pneg %p1216_p13 }
  0x17   : > { %s1017_s26 = scalar_lea.hbm %s1498_s0, 512  ;;  %p1018_p4 = scmp.lt.s32.totalorder %s1212_s12, %s1498_s0 }
  0x18   : > { %p1015_p2 = pnand %p1014_p1, %p1013_p0  ;;  %p1019_p5 = scmp.lt.s32.totalorder %s1017_s26, %s1012_s17 }
  0x1a   : > { %p1016_p3 = pneg %p1015_p2  ;;  %p1020_p7 = por %p1019_p5, %p1018_p4 }
  0x1c   : > { %p1021_p8 = pnand %p1020_p7, %p1016_p3 }
  0x1e   : > { %1024 = shalt.err (!%p1021_p8)
}
  0x1f   : > { %s1025_s7 = scalar_lea.vmem %s1220_s14, 256  ;;  %s1106_s9 = smov [#allocation4]  }
  0x20   : > { %p1026_p10 = scmp.ne.s32.totalorder %s1220_s14, %s1025_s7  ;;  %s1030_s10 = sshll.u32 %s1106_s9, 4  ;;  %s1031_s10 = int_to_ptr.vmem [resolvable:$false] %s1030_s10 }
  0x21   : > { %s1032_s11 = scalar_lea.vmem %s1031_s10, 512  ;;  %p1033_p2 = scmp.lt.s32.totalorder %s1220_s14, %s1031_s10 }
  0x22   : > { %p1028_p9 = pnand %p1026_p10, %p1014_p1  ;;  %p1034_p12 = scmp.lt.s32.totalorder %s1032_s11, %s1025_s7 }
  0x24   : > { %p1029_p0 = pneg %p1028_p9  ;;  %p1035_p11 = por %p1034_p12, %p1033_p2 }
  0x26   : > { %p1036_p6 = pnand %p1035_p11, %p1029_p0 }
  0x28   : > { %1039 = shalt.err (!%p1036_p6)
}
  0x29   : > { %s1107_s13 = smov 128   ;;  %s1108_s17 = smov 8  }
  0x2a   : > { %956 = dma.hbm_to_vmem [thread:$0]  (!%p1216_p13), %s1212_s12, 256, %s1220_s14, %s1222_s16, %s1107_s13, %s1107_s13, %s1108_s17  }
  0x2b   : > { %p916_p9 = scmp.ge.s32.totalorder %s1104_s21, 1  ;;  %p206_p1 = scmp.lt.s32.totalorder %s1104_s21, 3 }
  0x2d   : > { %p207_p3 = pnand %p916_p9, %p206_p1 }
  0x2e   : > { %s1246_s23 = sand.u32 (!%p207_p3), 1, %s1096_s19   ;;  %p1511_p6 = scmp.ne.s32.totalorder (!%p207_p3), %s1507_s29, 0 }
  0x2f   : > { %210 = sbr.rel (%p207_p3) target bundleno = 768 (0x300), region = 40  ;;  %s917_s25 = sshll.u32 (!%p207_p3), %s1246_s23, 4 }
  0x30   : > { %s213_s26 = scalar_lea.sflag (!%p207_p3), [#allocation5], %s1246_s23  ;;  %s216_s28 = scalar_lea.vmem (!%p207_p3), [#allocation4], %s917_s25 }
  0x34   : > { %v246_v0 = vlaneseq }
  0x35   : > { %1083 = dma.done.wait (%p1511_p6), %s213_s26, 256  }
  0x36   : > { %1085 = vsyncadd (%p1511_p6), %s213_s26, 4294967040  ;;  %v1109_v1 = vmov 0   ;;  %v247_v2 = vand.u32 127, %v246_v0  ;;  %v1256_v6 = vld [vmem:[%s216_s28] sm:$0xff]  ;;  %v1258_v7 = vld [vmem:[%s216_s28 + $0x8] sm:$0xff]  ;;  %s1110_s29 = smov 15  }
  0x37   : > { %277 = vst [vmem:[#allocation2] sm:$0xf] %v1109_v1  ;;  %278 = vst [vmem:[#allocation2 + $0x10] sm:$0xf] %v1109_v1  ;;  %1006 = vset.pattern.permute.xlu0 %v1109_v1  ;;  %814 = vmatprep.mubr.bf16.mxu1 %v1109_v1  ;;  %s1111_s12 = smov 127   ;;  %s1112_s14 = smov 1  }
  0x38   : > { %279 = vst [vmem:[#allocation2 + $0xc] sm:$0xf] %v1109_v1  ;;  %280 = vst [vmem:[#allocation2 + $0x1c] sm:$0xf] %v1109_v1  ;;  %1007 = vset.pattern.permute.xlu1 %v1109_v1  ;;  %v248_v3 = vadd.s32 128, %v247_v2  ;;  %v253_v4 = vand.u32 15, %v247_v2 }
  0x39   : > { %283 = vst [vmem:[#allocation2 + $0x4] sm:$0xff] %v1256_v6  ;;  %284 = vst [vmem:[#allocation2 + $0x14] sm:$0xff] %v1258_v7  ;;  %s1113_s15 = smov 113   ;;  %s1114_s16 = smov 111   ;;  %vm399_vm6 = vcmask 121856   ;;  %vm439_vm9 = vcmask 7168  }
  0x3a   : > { %v260_v5 = vand.u32 15, %v248_v3  ;;  %vm273_vm0 = vcmp.ge.s32.totalorder %v253_v4, 1  ;;  %vm275_vm1 = vcmp.le.s32.totalorder %v253_v4, 14  ;;  %s1115_s8 = smov 17   ;;  %s1116_s7 = smov 112   ;;  %vm414_vm12 = vcmask 1039360  }
  0x3b   : > { %s1117_s9 = smov 16   ;;  %vm322_vm14 = vcmask 1043456   ;;  %vm548_vm15 = vcmask 916480   ;;  %v613_v30 = vld [vmem:[%s1500_s2] sm:$0xff]  ;;  %p1524_p12 = scmp.ne.s32.totalorder %s1508_s30, 0 }
  0x3c   : > { %vm274_vm2 = vcmp.ge.s32.totalorder %v260_v5, 1  ;;  %vm276_vm3 = vcmp.le.s32.totalorder %v260_v5, 14  ;;  %s1118_s10 = smov [#allocation7]  }
  0x3d   : > { %vm293_vm4 = vmpackc.low %vm274_vm2, %vm273_vm0  ;;  %s1044_s11 = sshll.u32 %s1118_s10, 4  ;;  %s1045_s11 = int_to_ptr.vmem [resolvable:$false] %s1044_s11 }
  0x3e   : > { %v294_v8 = vsel %vm293_vm4, 65537, %v1109_v1  ;;  %vm369_vm5 = vmpackc.low %vm276_vm3, %vm275_vm1  ;;  %vm374_vm1 = vcmask 924672   ;;  %vm298_vm4 = vcmask 908288   ;;  %s1046_s13 = scalar_lea.vmem %s1045_s11, 512 }
  0x3f   : > { %493 = vrot.lane.b32.xlu0 %v294_v8, %s1110_s29  ;;  %411 = vrot.lane.b32.xlu1 %v294_v8, %s1111_s12  ;;  %v370_v9 = vsel %vm369_vm5, 65537, %v1109_v1  ;;  %v528_v10 = vld [vmem:[#allocation2 + $0xc] sm:$0xf]  ;;  %v530_v11 = vld [vmem:[#allocation2 + $0x1c] sm:$0xf] }
  0x40   : > { %v333_v12 = vld [vmem:[#allocation2 + $0x8] sm:$0xf]  ;;  %v1270_v13 = vld [vmem:[#allocation2] sm:$0xff]  ;;  %v335_v14 = vld [vmem:[#allocation2 + $0x18] sm:$0xf] }
  0x41   : > { %v1273_v15 = vld [vmem:[#allocation2 + $0x10] sm:$0xff]  ;;  %v490_v19 = vld [vmem:[#allocation2 + $0xc] sm:$0xf]  ;;  %v492_v27 = vld [vmem:[#allocation2 + $0x1c] sm:$0xf] }
  0x42   : > { %v452_v29 = vld [vmem:[#allocation2 + $0xc] sm:$0xf]  ;;  %v454_v40 = vld [vmem:[#allocation2 + $0x1c] sm:$0xf]  ;;  %v408_v42 = vld [vmem:[#allocation2 + $0x8] sm:$0xf] }
  0x43   : > { %455 = vrot.lane.b32.xlu0 %v370_v9, %s1112_s14  ;;  %371 = vrot.lane.b32.xlu1 %v370_v9, %s1113_s15  ;;  %v410_v59 = vld [vmem:[#allocation2 + $0x18] sm:$0xf]  ;;  %v362_v63 = vld [vmem:[#allocation2 + $0x8] sm:$0xf]  ;;  %v557_v21 = vld [vmem:[#allocation2 + $0xc] sm:$0xf] }
  0x47   : > { %295 = vrot.lane.b32.xlu0 %v294_v8, %s1114_s16  ;;  %560 = vrot.lane.b32.xlu1 %v370_v9, %s1115_s8  ;;  %v364_v8 = vld [vmem:[#allocation2 + $0x18] sm:$0xf] }
  0x4b   : > { %535 = vrot.lane.b32.xlu0 %v1256_v6, %s1116_s7  ;;  %537 = vrot.lane.b32.xlu1 %v528_v10, %s1116_s7  ;;  %v286_v10 = vld [vmem:[#allocation2 + $0x8] sm:$0xf] }
  0x4f   : > { %539 = vrot.lane.b32.xlu0 %v1258_v7, %s1116_s7  ;;  %541 = vrot.lane.b32.xlu1 %v530_v11, %s1116_s7 }
  0x53   : > { %342 = vrot.lane.b32.xlu1 %v333_v12, %s1117_s9  ;;  %340 = vrot.lane.b32.xlu0 %v1270_v13, %s1117_s9 }
  0x57   : > { %346 = vrot.lane.b32.xlu1 %v335_v14, %s1117_s9  ;;  %344 = vrot.lane.b32.xlu0 %v1273_v15, %s1117_s9 }
  0xb1   : > { %v494_v16 = vpop.permute.xlu0 %493  ;;  %v412_v17 = vpop.permute.xlu1 %411 }
  0xb2   : > { %v495_v18 = vrot.slane %v494_v16, 4  ;;  %v413_v36 = vrot.slane %v412_v17, 4 }
  0xb4   : > { %v496_v20 = vsel %vm399_vm6, %v495_v18, %v494_v16  ;;  %vm1277_vm7 = vcmp.ne.s16.totalorder %v495_v18, 0  ;;  %v415_v41 = vsel %vm414_vm12, %v413_v36, %v412_v17  ;;  %vm1309_vm13 = vcmp.ne.s16.totalorder %v413_v36, 0 }
  0xb5   : > { %vm497_vm8 = vcmp.ne.s16.totalorder %v496_v20, 0  ;;  %v500_v22 = vsel %vm1277_vm7, %v490_v19, 0  ;;  %v456_v23 = vpop.permute.xlu0 %455  ;;  %v372_v24 = vpop.permute.xlu1 %371  ;;  %v502_v31 = vsel %vm1277_vm7, %v492_v27, 0  ;;  %vm416_vm0 = vcmp.ne.s16.totalorder %v415_v41, 0  ;;  %v288_v19 = vld [vmem:[#allocation2 + $0x18] sm:$0xf] }
  0xb6   : > { %509 = vrot.lane.b32.xlu1 %v500_v22, %s1113_s15  ;;  %v457_v25 = vrot.slane %v456_v23, 4  ;;  %v499_v26 = vsel %vm497_vm8, %v1256_v6, 0  ;;  %v501_v34 = vsel %vm497_vm8, %v1258_v7, 0  ;;  %v419_v52 = vsel %vm1309_vm13, %v408_v42, 0 }
  0xb7   : > { %507 = vrot.lane.b32.xlu0 %v499_v26, %s1113_s15  ;;  %v373_v54 = vrot.slane %v372_v24, 4  ;;  %v418_v58 = vsel %vm416_vm0, %v1270_v13, 0  ;;  %v421_v1 = vsel %vm1309_vm13, %v410_v59, 0  ;;  %v420_v2 = vsel %vm416_vm0, %v1273_v15, 0 }
  0xb8   : > { %v458_v28 = vsel %vm439_vm9, %v457_v25, %v456_v23  ;;  %vm1288_vm10 = vcmp.ne.s16.totalorder %v457_v25, 0  ;;  %vm324_vm8 = vcmask 138240   ;;  %v1377_v25 = vld [vmem:[%s1499_s1] sm:$0xff]  ;;  %vm353_vm13 = vcmask 130048  }
  0xb9   : > { %v1294_v32 = vpop.permute.xlu0 %295  ;;  %v1296_v33 = vpop.permute.xlu1 %560  ;;  %vm459_vm11 = vcmp.ne.s16.totalorder %v458_v28, 0  ;;  %v462_v35 = vsel %vm1288_vm10, %v452_v29, 0  ;;  %v464_v44 = vsel %vm1288_vm10, %v454_v40, 0  ;;  %v375_v62 = vsel %vm374_vm1, %v373_v54, %v372_v24  ;;  %v559_v28 = vld [vmem:[#allocation2 + $0x1c] sm:$0xf] }
  0xba   : > { %513 = vrot.lane.b32.xlu1 %v502_v31, %s1113_s15  ;;  %v461_v39 = vsel %vm459_vm11, %v1256_v6, 0  ;;  %v463_v49 = vsel %vm459_vm11, %v1258_v7, 0  ;;  %vm1328_vm2 = vcmp.ne.s16.totalorder %v373_v54, 0  ;;  %vm376_vm3 = vcmp.ne.s16.totalorder %v375_v62, 0 }
  0xbb   : > { %511 = vrot.lane.b32.xlu0 %v501_v34, %s1113_s15  ;;  %v379_v3 = vsel %vm1328_vm2, %v362_v63, 0  ;;  %v297_v4 = vrot.slane %v1294_v32, 4  ;;  %v378_v5 = vsel %vm376_vm3, %v1270_v13, 0  ;;  %v381_v12 = vsel %vm1328_vm2, %v364_v8, 0  ;;  %s242_s15 = scalar_lea.vmem [#allocation7], %s917_s25 }
  0xbc   : > { %v380_v14 = vsel %vm376_vm3, %v1273_v15, 0  ;;  %v562_v17 = vrot.slane %v1296_v33, 4  ;;  %v920_v26 = vcombine.high %v1377_v25, %v1377_v25  ;;  %v930_v63 = vcombine.high %v1256_v6, %v1258_v7 }
  0xbd   : > { %v536_v37 = vpop.permute.xlu0 %535  ;;  %v538_v38 = vpop.permute.xlu1 %537  ;;  %v299_v9 = vsel %vm298_vm4, %v297_v4, %v1294_v32  ;;  %vm1346_vm5 = vcmp.ne.s16.totalorder %v297_v4, 0 }
  0xbe   : > { %471 = vrot.lane.b32.xlu1 %v462_v35, %s1111_s12  ;;  %v543_v45 = vrot.slane %v536_v37, 4  ;;  %v544_v46 = vrot.slane %v538_v38, 4  ;;  %vm300_vm7 = vcmp.ne.s16.totalorder %v299_v9, 0  ;;  %v303_v16 = vsel %vm1346_vm5, %v286_v10, 0  ;;  %939 = vmatprep.mubr.msk.bf16.mxu0 %vm353_vm13, %v920_v26 }
  0xbf   : > { %469 = vrot.lane.b32.xlu0 %v461_v39, %s1111_s12  ;;  %v302_v18 = vsel %vm300_vm7, %v1270_v13, 0  ;;  %v563_v20 = vsel %vm324_vm8, %v562_v17, %v1296_v33  ;;  %vm1363_vm10 = vcmp.ne.s16.totalorder %v562_v17, 0  ;;  %v305_v23 = vsel %vm1346_vm5, %v288_v19, 0 }
  0xc0   : > { %v547_v53 = vsel %vm322_vm14, %v543_v45, %v544_v46  ;;  %v304_v24 = vsel %vm300_vm7, %v1273_v15, 0  ;;  %vm564_vm11 = vcmp.ne.s16.totalorder %v563_v20, 0  ;;  %v567_v13 = vsel %vm1363_vm10, %v557_v21, 0 }
  0xc1   : > { %v540_v47 = vpop.permute.xlu0 %539  ;;  %v542_v48 = vpop.permute.xlu1 %541  ;;  %v549_v55 = vsel %vm548_vm15, %v536_v37, %v547_v53  ;;  %v566_v27 = vsel %vm564_vm11, %v1256_v6, 0  ;;  %v569_v15 = vsel %vm1363_vm10, %v559_v28, 0  ;;  %v568_v29 = vsel %vm564_vm11, %v1258_v7, 0 }
  0xc2   : > { %475 = vrot.lane.b32.xlu1 %v464_v44, %s1111_s12  ;;  %v545_v50 = vrot.slane %v540_v47, 4  ;;  %v546_v51 = vrot.slane %v542_v48, 4  ;;  %v929_v9 = vcombine.low %v1256_v6, %v1258_v7 }
  0xc3   : > { %473 = vrot.lane.b32.xlu0 %v463_v49, %s1111_s12 }
  0xc4   : > { %v550_v56 = vsel %vm322_vm14, %v545_v50, %v546_v51 }
  0xc5   : > { %v551_v57 = vsel %vm548_vm15, %v540_v47, %v550_v56  ;;  %v1393_v31 = vpop.permute.xlu1 %342  ;;  %v1395_v32 = vpop.permute.xlu0 %340 }
  0xc6   : > { %428 = vrot.lane.b32.xlu1 %v419_v52, %s1112_s14  ;;  %v936_v60 = vcombine.high %v549_v55, %v551_v57  ;;  %v935_v61 = vcombine.low %v549_v55, %v551_v57 }
  0xc7   : > { %426 = vrot.lane.b32.xlu0 %v418_v58, %s1112_s14 }
  0xc8   : > { %719 = vmatprep.subr.bf16.mxu0 %v936_v60 }
  0xc9   : > { %720 = vmatpush1.bf16.msra.mxu0 %v935_v61  ;;  %v1397_v33 = vpop.permute.xlu1 %346  ;;  %v1399_v34 = vpop.permute.xlu0 %344 }
  0xca   : > { %432 = vrot.lane.b32.xlu1 %v421_v1, %s1112_s14  ;;  %v350_v19 = vrot.slane %v1399_v34, 4 }
  0xcb   : > { %430 = vrot.lane.b32.xlu0 %v420_v2, %s1112_s14  ;;  %s948_s14 = sshll.u32 %s1170_s22, 8  ;;  %s826_s22 = scalar_lea.sflag [#allocation6], %s1246_s23 }
  0xcc   : > { %s1455_s9 = scalar_lea.hbm %s1503_s5, %s948_s14 }
  0xce   : > { %388 = vrot.lane.b32.xlu1 %v379_v3, %s1110_s29 }
  0xcf   : > { %386 = vrot.lane.b32.xlu0 %v378_v5, %s1110_s29 }
  0xd2   : > { %392 = vrot.lane.b32.xlu1 %v381_v12, %s1110_s29  ;;  %v349_v12 = vrot.slane %v1393_v31, 4 }
  0xd3   : > { %390 = vrot.lane.b32.xlu0 %v380_v14, %s1110_s29  ;;  %v348_v14 = vrot.slane %v1395_v32, 4 }
  0xd5   : > { %v352_v28 = vsel %vm322_vm14, %v348_v14, %v349_v12 }
  0xd6   : > { %312 = vrot.lane.b32.xlu1 %v303_v16, %s1115_s8 }
  0xd7   : > { %310 = vrot.lane.b32.xlu0 %v302_v18, %s1115_s8  ;;  %v351_v18 = vrot.slane %v1397_v33, 4 }
  0xda   : > { %316 = vrot.lane.b32.xlu1 %v305_v23, %s1115_s8 }
  0xdb   : > { %314 = vrot.lane.b32.xlu0 %v304_v24, %s1115_s8 }
  0xde   : > { %576 = vrot.lane.b32.xlu1 %v567_v13, %s1114_s16 }
  0xdf   : > { %574 = vrot.lane.b32.xlu0 %v566_v27, %s1114_s16 }
  0xe2   : > { %580 = vrot.lane.b32.xlu1 %v569_v15, %s1114_s16  ;;  %v355_v15 = vsel %vm322_vm14, %v350_v19, %v351_v18 }
  0xe3   : > { %578 = vrot.lane.b32.xlu0 %v568_v29, %s1114_s16  ;;  %s840_s16 = sshll.u32 %s242_s15, 4  ;;  %s1457_s16 = int_to_ptr.vmem [resolvable:$true] %s840_s16 }
  0xe4   : > { %s1040_s25 = scalar_lea.vmem %s1457_s16, 256  ;;  %p1047_p5 = scmp.lt.s32.totalorder %s1457_s16, %s1045_s11 }
  0xe5   : > { %p1041_p11 = scmp.ne.s32.totalorder %s1457_s16, %s1040_s25  ;;  %p1048_p7 = scmp.lt.s32.totalorder %s1046_s13, %s1040_s25 }
  0xe7   : > { %616 = vperm.xlu0 %1006, %v613_v30   ;;  %p1042_p13 = pnand %p1041_p11, %p1524_p12  ;;  %p1049_p8 = por %p1048_p7, %p1047_p5 }
  0xe9   : > { %p1043_p4 = pneg %p1042_p13 }
  0xeb   : > { %p1050_p10 = pnand %p1049_p8, %p1043_p4 }
 0x128   : > { %v510_v35 = vpop.permute.xlu1 %509 }
 0x129   : > { %v508_v36 = vpop.permute.xlu0 %507  ;;  %v516_v37 = vrot.slane %v510_v35, 4  ;;  %v354_v35 = vsel %vm353_vm13, %v1395_v32, %v352_v28 }
 0x12a   : > { %v515_v38 = vrot.slane %v508_v36, 4 }
 0x12c   : > { %v514_v39 = vpop.permute.xlu1 %513  ;;  %v519_v42 = vsel %vm322_vm14, %v515_v38, %v516_v37 }
 0x12d   : > { %v518_v40 = vrot.slane %v514_v39, 4  ;;  %v512_v41 = vpop.permute.xlu0 %511  ;;  %v520_v46 = vsel %vm374_vm1, %v508_v36, %v519_v42  ;;  %v356_v36 = vsel %vm353_vm13, %v1399_v34, %v355_v15 }
 0x12e   : > { %v517_v43 = vrot.slane %v512_v41, 4  ;;  %v923_v34 = vcombine.low %v354_v35, %v356_v36 }
 0x130   : > { %v521_v44 = vsel %vm322_vm14, %v517_v43, %v518_v40  ;;  %v472_v45 = vpop.permute.xlu1 %471 }
 0x131   : > { %v522_v47 = vsel %vm374_vm1, %v512_v41, %v521_v44  ;;  %v470_v48 = vpop.permute.xlu0 %469  ;;  %v478_v51 = vrot.slane %v472_v45, 4  ;;  %v924_v44 = vcombine.high %v354_v35, %v356_v36 }
 0x132   : > { %v933_v49 = vcombine.low %v520_v46, %v522_v47  ;;  %v934_v50 = vcombine.high %v520_v46, %v522_v47  ;;  %v477_v52 = vrot.slane %v470_v48, 4 }
 0x134   : > { %v476_v53 = vpop.permute.xlu1 %475  ;;  %721 = vmatprep.subr.bf16.mxu0 %v934_v50  ;;  %v481_v56 = vsel %vm322_vm14, %v477_v52, %v478_v51 }
 0x135   : > { %v480_v54 = vrot.slane %v476_v53, 4  ;;  %722 = vmatpush1.bf16.msra.mxu0 %v933_v49  ;;  %v474_v55 = vpop.permute.xlu0 %473  ;;  %v482_v60 = vsel %vm414_vm12, %v470_v48, %v481_v56 }
 0x136   : > { %v479_v57 = vrot.slane %v474_v55, 4 }
 0x138   : > { %v483_v58 = vsel %vm322_vm14, %v479_v57, %v480_v54  ;;  %v429_v59 = vpop.permute.xlu1 %428 }
 0x139   : > { %v484_v61 = vsel %vm414_vm12, %v474_v55, %v483_v58  ;;  %v427_v62 = vpop.permute.xlu0 %426  ;;  %v435_v2 = vrot.slane %v429_v59, 4 }
 0x13a   : > { %v931_v0 = vcombine.low %v482_v60, %v484_v61  ;;  %v932_v1 = vcombine.high %v482_v60, %v484_v61  ;;  %v434_v3 = vrot.slane %v427_v62, 4 }
 0x13c   : > { %v433_v4 = vpop.permute.xlu1 %432  ;;  %723 = vmatprep.subr.bf16.mxu0 %v932_v1  ;;  %v438_v10 = vsel %vm322_vm14, %v434_v3, %v435_v2 }
 0x13d   : > { %v437_v5 = vrot.slane %v433_v4, 4  ;;  %724 = vmatpush1.bf16.msra.mxu0 %v931_v0  ;;  %v431_v8 = vpop.permute.xlu0 %430  ;;  %v440_v20 = vsel %vm439_vm9, %v427_v62, %v438_v10  ;;  %v919_v4 = vcombine.low %v1377_v25, %v1377_v25 }
 0x13e   : > { %v436_v11 = vrot.slane %v431_v8, 4  ;;  %725 = vmatprep.subr.bf16.mxu0 %v930_v63 }
 0x140   : > { %v441_v16 = vsel %vm322_vm14, %v436_v11, %v437_v5  ;;  %v389_v17 = vpop.permute.xlu1 %388  ;;  %v765_v5 = vld [vmem:[%s1502_s4] sm:$0xff] }
 0x141   : > { %v442_v21 = vsel %vm439_vm9, %v431_v8, %v441_v16  ;;  %726 = vmatpush1.bf16.msra.mxu0 %v929_v9  ;;  %v387_v6 = vpop.permute.xlu0 %386  ;;  %v395_v23 = vrot.slane %v389_v17, 4  ;;  %768 = vperm.xlu1 %1007, %v765_v5  }
 0x142   : > { %v927_v7 = vcombine.low %v440_v20, %v442_v21  ;;  %v928_v22 = vcombine.high %v440_v20, %v442_v21  ;;  %v394_v24 = vrot.slane %v387_v6, 4  ;;  %v762_v21 = vld [vmem:[%s1501_s3] sm:$0xf] }
 0x144   : > { %v393_v13 = vpop.permute.xlu1 %392  ;;  %727 = vmatprep.subr.bf16.mxu0 %v928_v22  ;;  %v398_v29 = vsel %vm322_vm14, %v394_v24, %v395_v23 }
 0x145   : > { %v397_v26 = vrot.slane %v393_v13, 4  ;;  %728 = vmatpush1.bf16.msra.mxu0 %v927_v7  ;;  %v391_v27 = vpop.permute.xlu0 %390  ;;  %v400_v37 = vsel %vm399_vm6, %v387_v6, %v398_v29 }
 0x146   : > { %v396_v30 = vrot.slane %v391_v27, 4 }
 0x148   : > { %v401_v31 = vsel %vm322_vm14, %v396_v30, %v397_v26  ;;  %v313_v33 = vpop.permute.xlu1 %312 }
 0x149   : > { %v402_v38 = vsel %vm399_vm6, %v391_v27, %v401_v31  ;;  %v311_v39 = vpop.permute.xlu0 %310  ;;  %v319_v42 = vrot.slane %v313_v33, 4  ;;  %vm771_vm6 = vcmask 64512  }
 0x14a   : > { %v925_v40 = vcombine.low %v400_v37, %v402_v38  ;;  %v926_v41 = vcombine.high %v400_v37, %v402_v38  ;;  %v318_v43 = vrot.slane %v311_v39, 4 }
 0x14c   : > { %v317_v45 = vpop.permute.xlu1 %316  ;;  %729 = vmatprep.subr.bf16.mxu0 %v926_v41  ;;  %v323_v32 = vsel %vm322_vm14, %v318_v43, %v319_v42 }
 0x14d   : > { %v321_v46 = vrot.slane %v317_v45, 4  ;;  %730 = vmatpush1.bf16.msra.mxu0 %v925_v40  ;;  %v315_v47 = vpop.permute.xlu0 %314  ;;  %v325_v51 = vsel %vm324_vm8, %v311_v39, %v323_v32 }
 0x14e   : > { %v320_v48 = vrot.slane %v315_v47, 4  ;;  %731 = vmatprep.subr.bf16.mxu0 %v924_v44 }
 0x150   : > { %v326_v49 = vsel %vm322_vm14, %v320_v48, %v321_v46  ;;  %v577_v50 = vpop.permute.xlu1 %576 }
 0x151   : > { %v327_v52 = vsel %vm324_vm8, %v315_v47, %v326_v49  ;;  %732 = vmatpush1.bf16.msra.mxu0 %v923_v34  ;;  %v575_v53 = vpop.permute.xlu0 %574  ;;  %v583_v56 = vrot.slane %v577_v50, 4 }
 0x152   : > { %v921_v54 = vcombine.low %v325_v51, %v327_v52  ;;  %v922_v55 = vcombine.high %v325_v51, %v327_v52  ;;  %v582_v57 = vrot.slane %v575_v53, 4 }
 0x154   : > { %v581_v58 = vpop.permute.xlu1 %580  ;;  %733 = vmatprep.subr.bf16.mxu0 %v922_v55  ;;  %v586_v61 = vsel %vm322_vm14, %v582_v57, %v583_v56 }
 0x155   : > { %v585_v59 = vrot.slane %v581_v58, 4  ;;  %734 = vmatpush1.bf16.msra.mxu0 %v921_v54  ;;  %v579_v60 = vpop.permute.xlu0 %578  ;;  %v587_v0 = vsel %vm298_vm4, %v575_v53, %v586_v61 }
 0x156   : > { %v584_v62 = vrot.slane %v579_v60, 4 }
 0x158   : > { %v588_v63 = vsel %vm322_vm14, %v584_v62, %v585_v59 }
 0x159   : > { %v589_v1 = vsel %vm298_vm4, %v579_v60, %v588_v63 }
 0x15a   : > { %v937_v2 = vcombine.low %v587_v0, %v589_v1  ;;  %v938_v3 = vcombine.high %v587_v0, %v589_v1 }
 0x15c   : > { %749 = vmatprep.subr.bf16.mxu0 %v938_v3 }
 0x15d   : > { %750 = vmatpush2.bf16.msra.mxu0 %v937_v2 }
 0x160   : > { %752 = vmatmul.mubr.bf16.vlgmr.msra.gmra.mxu0 %v919_v4 }
 0x162   : > { %v617_v8 = vpop.permute.xlu0 %616 }
 0x1bc   : > { %v769_v6 = vpop.permute.xlu1 %768 }
 0x220   : > { %v753_v9 = vpop.f32.mrf.mxu0 }
 0x221   : > { %v754_v10 = vadd.f32 %v753_v9, %v617_v8 }
 0x222   : > { %v755_v11 = vpop.f32.mrf.mxu0 }
 0x223   : > { %v760_v12 = vmax.f32 %v754_v10, 0.0  ;;  %v756_v14 = vadd.f32 %v755_v11, %v617_v8 }
 0x224   : > { %v757_v16 = vpop.f32.mrf.mxu0 }
 0x225   : > { %v763_v17 = vpack.c.bf16 %v760_v12, %v760_v12  ;;  %v761_v18 = vmax.f32 %v756_v14, 0.0 }
 0x226   : > { %v758_v19 = vpop.f32.mrf.mxu0 }
 0x227   : > { %v764_v25 = vpack.c.bf16 %v761_v18, %v761_v18  ;;  %v777_v20 = vsel %vm322_vm14, %v763_v17, 0 }
 0x229   : > { %940 = vmatprep.subr.msk.bf16.mxu1 %vm322_vm14, %v764_v25 }
 0x22a   : > { %797 = vmatpush1.bf16.msra.mxu1 %v777_v20 }
 0x22d   : > { %941 = vmatmul.mubr.msk.bf16.vlgmr.msra.gmra.mxu1 %vm771_vm6, %v762_v21 }
 0x2ed   : > { %v816_v7 = vpop.f32.mrf.mxu1 }
 0x2ee   : > { %v817_v22 = vadd.f32 %v816_v7, %v769_v6 }
 0x2ef   : > { %v818_v23 = vpop.f32.mrf.mxu1 }
 0x2f0   : > { %823 = vst [vmem:[%s242_s15] sm:$0xff] %v817_v22  ;;  %v819_v24 = vadd.f32 %v818_v23, %v769_v6 }
 0x2f1   : > { %v820_v13 = vpop.f32.mrf.mxu1 }
 0x2f2   : > { %824 = vst [vmem:[%s242_s15 + $0x8] sm:$0xff] %v819_v24 }
 0x2f3   : > { %v821_v26 = vpop.f32.mrf.mxu1 }
 0x2f4   : > { %1053 = shalt.err (!%p1050_p10)
}
 0x2f5   : > { %s1054_s17 = scalar_lea.hbm %s1455_s9, 256  ;;  %s1058_s28 = scalar_lea.hbm %s1503_s5, 512 }
 0x2f6   : > { %p1055_p0 = scmp.ne.s32.totalorder %s1455_s9, %s1054_s17  ;;  %p1059_p1 = scmp.lt.s32.totalorder %s1455_s9, %s1503_s5 }
 0x2f7   : > { %p1060_p3 = scmp.lt.s32.totalorder %s1058_s28, %s1054_s17 }
 0x2f8   : > { %p1056_p2 = pnand %p1055_p0, %p1524_p12 }
 0x2f9   : > { %p1061_p6 = por %p1060_p3, %p1059_p1 }
 0x2fa   : > { %p1057_p9 = pneg %p1056_p2 }
 0x2fc   : > { %p1062_p11 = pnand %p1061_p6, %p1057_p9 }
 0x2fe   : > { %1065 = shalt.err (!%p1062_p11)
}
 0x2ff   : > { %951 = dma.vmem_to_hbm [thread:$0]  (%p1524_p12), %s1457_s16, 256, %s1455_s9, %s826_s22  }
 0x300 PF: > { %s852_s14 = sand.u32 1, %s1092_s18   ;;  %p1525_p13 = scmp.ne.s32.totalorder %s1509_s6, 0 }
 0x301   : > { %p1526_p4 = scmp.ge.s32.totalorder %s1104_s21, 2  ;;  %s853_s15 = scalar_lea.sflag [#allocation6], %s852_s14 }
 0x303   : > { %p958_p5 = pnand %p1526_p4, %p1525_p13 }
 0x305   : > { %p959_p7 = pneg %p958_p5 }
 0x307   : > { %1087 = dma.done.wait (%p959_p7), %s853_s15, 256  }
 0x308   : > { %1089 = vsyncadd (%p959_p7), %s853_s15, 4294967040  ;;  %p18_p8 = scmp.ge.s32.totalorder %s1174_s24, 4   ;;  %s1527_s18 = smov %s1096_s19 }
 0x309   : > { %s1528_s19 = smov %s1100_s20  ;;  %s1529_s20 = smov %s1186_s27 }
 0x30a   : > { %s1530_s21 = smov %s1174_s24  ;;  %20 = sbr.rel (!%p18_p8) target bundleno = 5 (0x5), region = 85 }
 0x30f   :  { %858 = vsyncpa [#allocation5], 1 }
 0x310   :  { %860 = vsyncpa [#allocation5 + $0x1], 1 }
 0x311   :  { %861 = vsyncpa [#allocation6], 1 }
 0x312   :  { %863 = vsyncpa [#allocation6 + $0x1], 1 }

</bundles_post_ra>
